<compile_context>
chip_gen: v5e
topology: v5e:2x2
jax: 0.10.0
libtpu: 0.0.40
codegen_flags: <defaults>
</compile_context>

<pallas_src>
import numpy as np
import jax
import jax.numpy as jnp
from jax.experimental import pallas as pl
from jax.experimental.pallas import tpu as pltpu


# ----------------------------------------------------------------------------
# db4 filters (pywt conventions: rec_lo = scaling filter, dec_lo = reversed,
# rec_hi = QMF of rec_lo, dec_hi = reversed rec_hi)
# ----------------------------------------------------------------------------
_DB4_REC_LO = np.array(
    [0.23037781330885523, 0.7148465705525415, 0.6308807679295904,
     -0.02798376941698385, -0.18703481171888114, 0.030841381835986965,
     0.032883011666982945, -0.010597401784997278],
    dtype=np.float64,
)


def _db4_filters():
    rec_lo = _DB4_REC_LO
    L = len(rec_lo)
    rec_hi = np.array([(-1.0) ** k * rec_lo[L - 1 - k] for k in range(L)])
    dec_lo = rec_lo[::-1].copy()
    dec_hi = rec_hi[::-1].copy()
    return dec_lo, dec_hi, rec_lo, rec_hi


def _dwt_max_level(n, filt_len):
    if n < filt_len - 1:
        return 0
    return int(np.floor(np.log2(n / (filt_len - 1.0))))


def _analysis_matrix(n, dec_lo, dec_hi):
    # pywt dwt, mode='zero':  coeff[i] = full_conv(x, dec)[2*i + 1]
    # Rows [0, o) -> lowpass (cA), rows [o, 2o) -> highpass (cD).
    L = len(dec_lo)
    o = (n + L - 1) // 2
    A = np.zeros((2 * o, n), dtype=np.float64)
    for i in range(o):
        for k in range(n):
            j = 2 * i + 1 - k
            if 0 <= j < L:
                A[i, k] = dec_lo[j]
                A[o + i, k] = dec_hi[j]
    return A


def _synthesis_matrix(o, rec_lo, rec_hi):
    # pywt idwt, mode='zero':  x_rec = S @ [cA ; cD],  len(x_rec) = 2*o - L + 2
    L = len(rec_lo)
    n_rec = 2 * o - L + 2
    S = np.zeros((n_rec, 2 * o), dtype=np.float64)
    for n in range(n_rec):
        for k in range(o):
            j = n + L - 2 - 2 * k
            if 0 <= j < L:
                S[n, k] = rec_lo[j]
                S[n, o + k] = rec_hi[j]
    return S


def _reshape_ths(ths, level_idx, numel=3):
    # mirrors _WaveletDenoiser.reshape_ths for python scalars / sequences
    if isinstance(ths, (int, float)):
        return [float(ths)] * numel
    ths = list(ths)
    if len(ths) == 1:
        return [float(ths[0])] * numel
    cur = ths[level_idx]
    if np.ndim(cur) == 0:
        return [float(cur)] * numel
    cur = list(cur)
    if len(cur) == 1:
        return [float(cur[0])] * numel
    return [float(v) for v in cur]


# ----------------------------------------------------------------------------
# Fused Pallas kernel: all levels of DWT + soft-threshold + IDWT per batch tile
# ----------------------------------------------------------------------------
def _build_fused_kernel(level, sizes, tb):
    """sizes[l] = (H_l, W_l, oh_l, ow_l) for analysis step l (finest first)."""
    assert level >= 1
    n_in = 2 + 4 * level

    def kernel(*refs):
        ths_ref = refs[0]                       # SMEM (3*level,) f32
        x_ref = refs[1]                         # VMEM (tb, H0, W0)
        a_refs = refs[2:2 + 2 * level]          # Ah_l (2oh,H), AwT_l (W,2ow)
        s_refs = refs[2 + 2 * level:n_in]       # Sh_l (Hr,2oh), SwT_l (2ow,Wr)
        out_ref = refs[n_in]                    # VMEM (tb, Hr0, Wr0)
        coeff_refs = refs[n_in + 1:]            # VMEM scratch slabs per level

        cur = x_ref[...]

        # ---- analysis (finest -> coarsest) + fused soft thresholding ------
        for l in range(level):
            _, _, oh, ow = sizes[l]
            ah = a_refs[2 * l][...]             # (2oh, H_l)
            awt = a_refs[2 * l + 1][...]        # (W_l, 2ow)
            awt_b = jnp.broadcast_to(awt, (tb,) + awt.shape)
            ah_b = jnp.broadcast_to(ah, (tb,) + ah.shape)
            t = jnp.einsum("bhw,bwj->bhj", cur, awt_b,
                           preferred_element_type=jnp.float32)
            y = jnp.einsum("bih,bhj->bij", ah_b, t,
                           preferred_element_type=jnp.float32)

            # quadrant threshold map from SMEM scalars (0 on cA == identity)
            row = jax.lax.broadcasted_iota(jnp.int32, (2 * oh, 2 * ow), 0)
            col = jax.lax.broadcasted_iota(jnp.int32, (2 * oh, 2 * ow), 1)
            a_row = row < oh
            a_col = col < ow
            th_h = ths_ref[3 * l + 0]   # cH ('da'): detail rows, approx cols
            th_v = ths_ref[3 * l + 1]   # cV ('ad'): approx rows, detail cols
            th_d = ths_ref[3 * l + 2]   # cD ('dd')
            ths_map = jnp.where(
                a_row & a_col, jnp.float32(0.0),
                jnp.where(a_row, th_v, jnp.where(a_col, th_h, th_d)))
            ths_map = ths_map[None]

            # soft threshold:  y - clip(y, -t, t)
            y = y - jnp.clip(y, -ths_map, ths_map)

            coeff_refs[l][...] = y
            cur = y[:, :oh, :ow]                # approximation -> next level

        # ---- synthesis (coarsest -> finest), cA write-back fused -----------
        rec = cur
        for l in reversed(range(level)):
            _, _, oh, ow = sizes[l]
            # waverec2 crops the (possibly 1-larger) approximation to fit
            coeff_refs[l][:, :oh, :ow] = rec[:, :oh, :ow]
            slab = coeff_refs[l][...]
            sh = s_refs[2 * l][...]             # (Hr, 2oh)
            swt = s_refs[2 * l + 1][...]        # (2ow, Wr)
            sh_b = jnp.broadcast_to(sh, (tb,) + sh.shape)
            swt_b = jnp.broadcast_to(swt, (tb,) + swt.shape)
            t = jnp.einsum("bih,bhj->bij", sh_b, slab,
                           preferred_element_type=jnp.float32)
            rec = jnp.einsum("bhw,bwj->bhj", t, swt_b,
                             preferred_element_type=jnp.float32)

        out_ref[...] = rec

    return kernel


# ----------------------------------------------------------------------------
# Forward pass (== _WaveletDenoiser.forward for wv='db4', wvdim=2, 'soft')
# ----------------------------------------------------------------------------
def wavelet_denoiser_forward(x, ths, level=None, wv="db4",
                             non_linearity="soft", wvdim=2):
    assert wv == "db4" and wvdim == 2
    if non_linearity != "soft":
        # TODO(synk): 'hard' and 'topk' non-linearities are not implemented.
        raise NotImplementedError("only non_linearity='soft' is implemented")

    dec_lo, dec_hi, rec_lo, rec_hi = _db4_filters()
    L = len(dec_lo)
    B, C, H, W = x.shape

    # pad_input: reproduce module's ReplicationPad2d((0, h % 2, 0, w % 2)),
    # i.e. width grows by H % 2 and height grows by W % 2 (module quirk).
    p = (H % 2, W % 2)
    if p[0] or p[1]:
        x = jnp.pad(x, ((0, 0), (0, 0), (0, p[1]), (0, p[0])), mode="edge")
    Hp, Wp = x.shape[-2], x.shape[-1]

    if level is None:
        level = min(_dwt_max_level(Hp, L), _dwt_max_level(Wp, L))

    BC = B * C
    cur = x.reshape(BC, Hp, Wp).astype(jnp.float32)

    if level == 0:
        y = cur.reshape(B, C, Hp, Wp)
        h, w = y.shape[-2], y.shape[-1]
        return y[..., : h - p[0], : w - p[1]]

    # static per-level geometry (finest level first)
    sizes = []
    h, w = Hp, Wp
    for _ in range(level):
        oh = (h + L - 1) // 2
        ow = (w + L - 1) // 2
        sizes.append((h, w, oh, ow))
        h, w = oh, ow
    Hr0 = 2 * sizes[0][2] - L + 2
    Wr0 = 2 * sizes[0][3] - L + 2

    # analysis / synthesis matrices (f32, full-block VMEM inputs)
    mats_a, mats_s = [], []
    for (h_l, w_l, oh, ow) in sizes:
        mats_a.append(jnp.asarray(_analysis_matrix(h_l, dec_lo, dec_hi), jnp.float32))
        mats_a.append(jnp.asarray(_analysis_matrix(w_l, dec_lo, dec_hi).T, jnp.float32))
        mats_s.append(jnp.asarray(_synthesis_matrix(oh, rec_lo, rec_hi), jnp.float32))
        mats_s.append(jnp.asarray(_synthesis_matrix(ow, rec_lo, rec_hi).T, jnp.float32))

    # per-level thresholds -> SMEM scalar table (index level-l == dec-list index)
    ths_tab = np.zeros((3 * level,), np.float32)
    for l in range(level):
        ths_tab[3 * l:3 * l + 3] = _reshape_ths(ths, level - l)
    ths_tab = jnp.asarray(ths_tab)

    # batch-tile size: amortize per-grid-step overhead, stay under a VMEM
    # budget that is safe even on v7x (64 MiB physical VMEM).
    def vmem_estimate(tb):
        byt = 4 * (2 * tb * Hp * Wp + 2 * tb * Hr0 * Wr0)   # dbuf in + out
        for (h_l, w_l, oh, ow) in sizes:
            hr, wr = 2 * oh - L + 2, 2 * ow - L + 2
            byt += 4 * tb * (2 * oh) * (2 * ow)              # scratch slab
            byt += 8 * ((2 * oh) * h_l + w_l * (2 * ow)
                        + hr * (2 * oh) + (2 * ow) * wr)     # matrices (dbuf)
            byt += 4 * tb * (h_l * (2 * ow)
                             + max((2 * oh) * h_l, w_l * (2 * ow),
                                   hr * (2 * oh), (2 * ow) * wr))  # live temps
        return byt

    TB = max(1, min(BC, 16))
    while TB > 1 and vmem_estimate(TB) > (24 << 20):
        TB //= 2
    BCp = ((BC + TB - 1) // TB) * TB
    if BCp != BC:
        cur = jnp.concatenate(
            [cur, jnp.zeros((BCp - BC, Hp, Wp), jnp.float32)], axis=0)

    in_specs = [
        pl.BlockSpec(memory_space=pltpu.MemorySpace.SMEM),      # threshold table
        pl.BlockSpec((TB, Hp, Wp), lambda b: (b, 0, 0)),        # image slabs
    ]
    for (h_l, w_l, oh, ow) in sizes:
        in_specs.append(pl.BlockSpec((2 * oh, h_l), lambda b: (0, 0)))   # Ah_l
        in_specs.append(pl.BlockSpec((w_l, 2 * ow), lambda b: (0, 0)))   # AwT_l
    for (h_l, w_l, oh, ow) in sizes:
        hr, wr = 2 * oh - L + 2, 2 * ow - L + 2
        in_specs.append(pl.BlockSpec((hr, 2 * oh), lambda b: (0, 0)))    # Sh_l
        in_specs.append(pl.BlockSpec((2 * ow, wr), lambda b: (0, 0)))    # SwT_l

    out_specs = pl.BlockSpec((TB, Hr0, Wr0), lambda b: (b, 0, 0))
    scratch_shapes = [pltpu.VMEM((TB, 2 * oh, 2 * ow), jnp.float32)
                      for (_, _, oh, ow) in sizes]

    kernel = _build_fused_kernel(level, sizes, TB)
    rec = pl.pallas_call(
        kernel,
        out_shape=jax.ShapeDtypeStruct((BCp, Hr0, Wr0), jnp.float32),
        grid=(BCp // TB,),
        in_specs=in_specs,
        out_specs=out_specs,
        scratch_shapes=scratch_shapes,
        compiler_params=pltpu.CompilerParams(
            dimension_semantics=("parallel",),   # v7x: shard batch over 2 TCs
            vmem_limit_bytes=int(min(max(2 * vmem_estimate(TB), 32 << 20),
                                     48 << 20)),
        ),
    )(ths_tab, cur, *mats_a, *mats_s)

    y = rec[:BC].reshape(B, C, Hr0, Wr0)

    # crop_output: out[..., :h - p[0], :w - p[1]]
    h, w = y.shape[-2], y.shape[-1]
    return y[..., : h - p[0], : w - p[1]]


# ----------------------------------------------------------------------------
# numpy reference (same matrix formulation, float64) for validation
# ----------------------------------------------------------------------------
def _reference_forward_np(x, ths, level=None):
    dec_lo, dec_hi, rec_lo, rec_hi = _db4_filters()
    L = len(dec_lo)
    B, C, H, W = x.shape
    p = (H % 2, W % 2)
    xp = np.asarray(x, np.float64)
    if p[0] or p[1]:
        xp = np.pad(xp, ((0, 0), (0, 0), (0, p[1]), (0, p[0])), mode="edge")
    Hp, Wp = xp.shape[-2:]
    if level is None:
        level = min(_dwt_max_level(Hp, L), _dwt_max_level(Wp, L))
    cur = xp.reshape(B * C, Hp, Wp)
    slabs = []
    for l in range(level):
        h, w = cur.shape[-2:]
        Ah = _analysis_matrix(h, dec_lo, dec_hi)
        Aw = _analysis_matrix(w, dec_lo, dec_hi)
        oh, ow = Ah.shape[0] // 2, Aw.shape[0] // 2
        y = np.einsum("ih,bhw,jw->bij", Ah, cur, Aw)
        t = _reshape_ths(ths, level - l)
        m = np.zeros((2 * oh, 2 * ow))
        m[oh:, :ow] = t[0]
        m[:oh, ow:] = t[1]
        m[oh:, ow:] = t[2]
        y = np.sign(y) * np.maximum(np.abs(y) - m, 0.0)
        slabs.append(y)
        cur = y[:, :oh, :ow]
    rec = cur
    for l in reversed(range(level)):
        slab = slabs[l].copy()
        oh, ow = slab.shape[1] // 2, slab.shape[2] // 2
        slab[:, :oh, :ow] = rec[:, :oh, :ow]
        Sh = _synthesis_matrix(oh, rec_lo, rec_hi)
        Sw = _synthesis_matrix(ow, rec_lo, rec_hi)
        rec = np.einsum("ih,bhw,jw->bij", Sh, slab, Sw)
    y = rec.reshape(B, C, rec.shape[-2], rec.shape[-1])
    h, w = y.shape[-2:]
    return (y[..., : h - p[0], : w - p[1]]).astype(np.float32)


if __name__ == "__main__":
    key = jax.random.PRNGKey(0)
    x = jax.random.normal(key, (2, 4, 16, 16), dtype=jnp.float32)
    ths = 0.1

    # 1) main run (level inferred = 1) + comparison against f64 reference
    y = jax.block_until_ready(wavelet_denoiser_forward(x, ths))
    assert y.shape == x.shape and y.dtype == jnp.float32
    y_ref = _reference_forward_np(np.asarray(x), ths)
    assert float(np.max(np.abs(np.asarray(y) - y_ref))) < 2e-4

    # 2) zero threshold -> orthogonal db4 transform round-trips
    y0 = jax.block_until_ready(wavelet_denoiser_forward(x, 0.0))
    assert float(jnp.max(jnp.abs(y0 - x))) < 1e-4

    # 3) multi-level path (32x32 -> level 2), threshold given as 1-elem list
    x2 = jax.random.normal(jax.random.PRNGKey(1), (1, 2, 32, 32),
                           dtype=jnp.float32)
    y2 = jax.block_until_ready(wavelet_denoiser_forward(x2, [0.05]))
    y2_ref = _reference_forward_np(np.asarray(x2), [0.05])
    assert y2.shape == x2.shape
    assert float(np.max(np.abs(np.asarray(y2) - y2_ref))) < 2e-4

    print("KERNEL_OK")
</pallas_src>

<mosaic_0001>
module attributes {stable_mosaic.version = 11 : i64} {
  func.func @kernel(%arg0: i32, %arg1: memref<3xf32, #tpu.memory_space<smem>>, %arg2: memref<8x16x16xf32, #tpu.memory_space<vmem>>, %arg3: memref<22x16xf32, #tpu.memory_space<vmem>>, %arg4: memref<16x22xf32, #tpu.memory_space<vmem>>, %arg5: memref<16x22xf32, #tpu.memory_space<vmem>>, %arg6: memref<22x16xf32, #tpu.memory_space<vmem>>, %arg7: memref<8x16x16xf32, #tpu.memory_space<vmem>>, %arg8: memref<8x22x22xf32, #tpu.memory_space<vmem>>) attributes {dimension_semantics = [#tpu.dimension_semantics<parallel>], iteration_bounds = array<i64: 1>, scalar_prefetch = 0 : i64, scratch_operands = 1 : i64, tpu.core_type = #tpu.core_type<tc>, window_params = [{transform_indices = @transform_0, window_bounds = array<i64: 3>}, {transform_indices = @transform_1, window_bounds = array<i64: 8, 16, 16>}, {pipeline_mode = #tpu.pipeline_mode<synchronous>, transform_indices = @transform_2, window_bounds = array<i64: 22, 16>}, {pipeline_mode = #tpu.pipeline_mode<synchronous>, transform_indices = @transform_3, window_bounds = array<i64: 16, 22>}, {pipeline_mode = #tpu.pipeline_mode<synchronous>, transform_indices = @transform_4, window_bounds = array<i64: 16, 22>}, {pipeline_mode = #tpu.pipeline_mode<synchronous>, transform_indices = @transform_5, window_bounds = array<i64: 22, 16>}, {transform_indices = @transform_6, window_bounds = array<i64: 8, 16, 16>}]} {
    %c0 = arith.constant 0 : index
    %c0_0 = arith.constant 0 : index
    %c0_1 = arith.constant 0 : index
    %0 = vector.load %arg2[%c0, %c0_0, %c0_1] : memref<8x16x16xf32, #tpu.memory_space<vmem>>, vector<8x16x16xf32>
    %c0_2 = arith.constant 0 : index
    %c0_3 = arith.constant 0 : index
    %1 = vector.load %arg3[%c0_2, %c0_3] : memref<22x16xf32, #tpu.memory_space<vmem>>, vector<22x16xf32>
    %c0_4 = arith.constant 0 : index
    %c0_5 = arith.constant 0 : index
    %2 = vector.load %arg4[%c0_4, %c0_5] : memref<16x22xf32, #tpu.memory_space<vmem>>, vector<16x22xf32>
    %3 = vector.shape_cast %2 : vector<16x22xf32> to vector<1x16x22xf32>
    %4 = vector.broadcast %3 : vector<1x16x22xf32> to vector<8x16x22xf32>
    %5 = vector.shape_cast %1 : vector<22x16xf32> to vector<1x22x16xf32>
    %6 = vector.broadcast %5 : vector<1x22x16xf32> to vector<8x22x16xf32>
    "tpu.trace_start"() <{level = 10 : i32, message = "bhw,bwj->bhj"}> : () -> ()
    %cst = arith.constant dense<0.000000e+00> : vector<8x16x22xf32>
    %7 = tpu.matmul %0, %4, %cst {dimension_numbers = #tpu.dot_dimension_numbers<[2], [1], [1], [2], [0, 0, 0, 1, 1, 2], [0], [0]>} : vector<8x16x16xf32>, vector<8x16x22xf32>, vector<8x16x22xf32> -> vector<8x16x22xf32>
    "tpu.trace_stop"() : () -> ()
    "tpu.trace_start"() <{level = 10 : i32, message = "bih,bhj->bij"}> : () -> ()
    %cst_6 = arith.constant dense<0.000000e+00> : vector<8x22x22xf32>
    %8 = tpu.matmul %6, %7, %cst_6 {dimension_numbers = #tpu.dot_dimension_numbers<[2], [1], [1], [2], [0, 0, 0, 1, 1, 2], [0], [0]>} : vector<8x22x16xf32>, vector<8x16x22xf32>, vector<8x22x22xf32> -> vector<8x22x22xf32>
    "tpu.trace_stop"() : () -> ()
    %9 = tpu.iota {dimensions = array<i32: 0>} : vector<22x22xi32>
    %10 = tpu.iota {dimensions = array<i32: 1>} : vector<22x22xi32>
    %c11_i32 = arith.constant 11 : i32
    %11 = vector.broadcast %c11_i32 : i32 to vector<22x22xi32>
    %12 = arith.cmpi slt, %9, %11 : vector<22x22xi32>
    %c11_i32_7 = arith.constant 11 : i32
    %13 = vector.broadcast %c11_i32_7 : i32 to vector<22x22xi32>
    %14 = arith.cmpi slt, %10, %13 : vector<22x22xi32>
    %c0_8 = arith.constant 0 : index
    %15 = memref.load %arg1[%c0_8] : memref<3xf32, #tpu.memory_space<smem>>
    %c1 = arith.constant 1 : index
    %16 = memref.load %arg1[%c1] : memref<3xf32, #tpu.memory_space<smem>>
    %c2 = arith.constant 2 : index
    %17 = memref.load %arg1[%c2] : memref<3xf32, #tpu.memory_space<smem>>
    %18 = arith.andi %12, %14 : vector<22x22xi1>
    %19 = vector.broadcast %15 : f32 to vector<22x22xf32>
    %20 = vector.broadcast %17 : f32 to vector<22x22xf32>
    %21 = arith.select %14, %19, %20 : vector<22x22xi1>, vector<22x22xf32>
    %22 = vector.broadcast %16 : f32 to vector<22x22xf32>
    %23 = arith.select %12, %22, %21 : vector<22x22xi1>, vector<22x22xf32>
    %cst_9 = arith.constant 0.000000e+00 : f32
    %24 = vector.broadcast %cst_9 : f32 to vector<22x22xf32>
    %25 = arith.select %18, %24, %23 : vector<22x22xi1>, vector<22x22xf32>
    %26 = vector.shape_cast %25 : vector<22x22xf32> to vector<1x22x22xf32>
    %cst_10 = arith.constant 0.000000e+00 : f32
    %27 = vector.broadcast %cst_10 : f32 to vector<1x22x22xf32>
    %28 = arith.subf %27, %26 : vector<1x22x22xf32>
    %29 = vector.broadcast %28 : vector<1x22x22xf32> to vector<8x22x22xf32>
    %30 = arith.maximumf %29, %8 : vector<8x22x22xf32>
    %31 = vector.broadcast %26 : vector<1x22x22xf32> to vector<8x22x22xf32>
    %32 = arith.minimumf %31, %30 : vector<8x22x22xf32>
    %33 = arith.subf %8, %32 : vector<8x22x22xf32>
    %c0_11 = arith.constant 0 : index
    %c0_12 = arith.constant 0 : index
    %c0_13 = arith.constant 0 : index
    %34 = vector.load %arg8[%c0_11, %c0_12, %c0_13] : memref<8x22x22xf32, #tpu.memory_space<vmem>>, vector<8x22x22xf32>
    tpu.vector_store %arg8[%c0_11, %c0_12, %c0_13], %33 {strides = array<i32>} : memref<8x22x22xf32, #tpu.memory_space<vmem>>, vector<8x22x22xf32>,
    %35 = vector.extract_strided_slice %33 {offsets = [0, 0, 0], sizes = [8, 11, 11], strides = [1, 1, 1]} : vector<8x22x22xf32> to vector<8x11x11xf32>
    %c0_14 = arith.constant 0 : index
    %c0_15 = arith.constant 0 : index
    %c0_16 = arith.constant 0 : index
    %36 = vector.load %arg8[%c0_14, %c0_15, %c0_16] : memref<8x22x22xf32, #tpu.memory_space<vmem>>, vector<8x11x11xf32>
    tpu.vector_store %arg8[%c0_14, %c0_15, %c0_16], %35 {strides = array<i32>} : memref<8x22x22xf32, #tpu.memory_space<vmem>>, vector<8x11x11xf32>,
    %c0_17 = arith.constant 0 : index
    %c0_18 = arith.constant 0 : index
    %c0_19 = arith.constant 0 : index
    %37 = vector.load %arg8[%c0_17, %c0_18, %c0_19] : memref<8x22x22xf32, #tpu.memory_space<vmem>>, vector<8x22x22xf32>
    %c0_20 = arith.constant 0 : index
    %c0_21 = arith.constant 0 : index
    %38 = vector.load %arg5[%c0_20, %c0_21] : memref<16x22xf32, #tpu.memory_space<vmem>>, vector<16x22xf32>
    %c0_22 = arith.constant 0 : index
    %c0_23 = arith.constant 0 : index
    %39 = vector.load %arg6[%c0_22, %c0_23] : memref<22x16xf32, #tpu.memory_space<vmem>>, vector<22x16xf32>
    %40 = vector.shape_cast %38 : vector<16x22xf32> to vector<1x16x22xf32>
    %41 = vector.broadcast %40 : vector<1x16x22xf32> to vector<8x16x22xf32>
    %42 = vector.shape_cast %39 : vector<22x16xf32> to vector<1x22x16xf32>
    %43 = vector.broadcast %42 : vector<1x22x16xf32> to vector<8x22x16xf32>
    "tpu.trace_start"() <{level = 10 : i32, message = "bih,bhj->bij"}> : () -> ()
    %cst_24 = arith.constant dense<0.000000e+00> : vector<8x16x22xf32>
    %44 = tpu.matmul %41, %37, %cst_24 {dimension_numbers = #tpu.dot_dimension_numbers<[2], [1], [1], [2], [0, 0, 0, 1, 1, 2], [0], [0]>} : vector<8x16x22xf32>, vector<8x22x22xf32>, vector<8x16x22xf32> -> vector<8x16x22xf32>
    "tpu.trace_stop"() : () -> ()
    "tpu.trace_start"() <{level = 10 : i32, message = "bhw,bwj->bhj"}> : () -> ()
    %cst_25 = arith.constant dense<0.000000e+00> : vector<8x16x16xf32>
    %45 = tpu.matmul %44, %43, %cst_25 {dimension_numbers = #tpu.dot_dimension_numbers<[2], [1], [1], [2], [0, 0, 0, 1, 1, 2], [0], [0]>} : vector<8x16x22xf32>, vector<8x22x16xf32>, vector<8x16x16xf32> -> vector<8x16x16xf32>
    "tpu.trace_stop"() : () -> ()
    %c0_26 = arith.constant 0 : index
    %c0_27 = arith.constant 0 : index
    %c0_28 = arith.constant 0 : index
    %46 = vector.load %arg7[%c0_26, %c0_27, %c0_28] : memref<8x16x16xf32, #tpu.memory_space<vmem>>, vector<8x16x16xf32>
    tpu.vector_store %arg7[%c0_26, %c0_27, %c0_28], %45 {strides = array<i32>} : memref<8x16x16xf32, #tpu.memory_space<vmem>>, vector<8x16x16xf32>,
    return
  }
  func.func @transform_0(%arg0: i32) -> i32 {
    %c0_i32 = arith.constant 0 : i32
    %c0_i32_0 = arith.constant 0 : i32
    return %c0_i32 : i32
  }
  func.func @transform_1(%arg0: i32) -> (i32, i32, i32) {
    %c0_i32 = arith.constant 0 : i32
    %c0_i32_0 = arith.constant 0 : i32
    %c0_i32_1 = arith.constant 0 : i32
    return %arg0, %c0_i32, %c0_i32_0 : i32, i32, i32
  }
  func.func @transform_2(%arg0: i32) -> (i32, i32) {
    %c0_i32 = arith.constant 0 : i32
    %c0_i32_0 = arith.constant 0 : i32
    %c0_i32_1 = arith.constant 0 : i32
    return %c0_i32, %c0_i32_0 : i32, i32
  }
  func.func @transform_3(%arg0: i32) -> (i32, i32) {
    %c0_i32 = arith.constant 0 : i32
    %c0_i32_0 = arith.constant 0 : i32
    %c0_i32_1 = arith.constant 0 : i32
    return %c0_i32, %c0_i32_0 : i32, i32
  }
  func.func @transform_4(%arg0: i32) -> (i32, i32) {
    %c0_i32 = arith.constant 0 : i32
    %c0_i32_0 = arith.constant 0 : i32
    %c0_i32_1 = arith.constant 0 : i32
    return %c0_i32, %c0_i32_0 : i32, i32
  }
  func.func @transform_5(%arg0: i32) -> (i32, i32) {
    %c0_i32 = arith.constant 0 : i32
    %c0_i32_0 = arith.constant 0 : i32
    %c0_i32_1 = arith.constant 0 : i32
    return %c0_i32, %c0_i32_0 : i32, i32
  }
  func.func @transform_6(%arg0: i32) -> (i32, i32, i32) {
    %c0_i32 = arith.constant 0 : i32
    %c0_i32_0 = arith.constant 0 : i32
    %c0_i32_1 = arith.constant 0 : i32
    return %arg0, %c0_i32, %c0_i32_0 : i32, i32, i32
  }
}

</mosaic_0001>

<bundles_post_ra>
// kernel: tpu_custom_call.1
= control target key start
LH: loop header
LB: loop body
LE: loop exit
PB: predicated region body
PF: predicated region fallthrough
CT: control target
= control target key end

     0   :  { %11 = vsyncpa [#allocation6], 0  ;;  %s1658_s0 = inlined_call_operand.vmem [shape: f32[3], index: 0, kind: input, shape index: {}]   ;;  %s1659_s1 = inlined_call_operand.hbm [shape: f32[8,16,16], index: 1, kind: input, shape index: {}]   ;;  %s1660_s2 = inlined_call_operand.vmem [shape: f32[22,16], index: 2, kind: input, shape index: {}]   ;;  %s1661_s3 = inlined_call_operand.vmem [shape: f32[16,22], index: 3, kind: input, shape index: {}]   ;;  %s1662_s4 = inlined_call_operand.vmem [shape: f32[16,22], index: 4, kind: input, shape index: {}]   ;;  %s1663_s5 = inlined_call_operand.vmem [shape: f32[22,16], index: 5, kind: input, shape index: {}]   ;;  %s1664_s6 = inlined_call_operand.hbm [shape: f32[8,16,16], index: 6, kind: output, shape index: {}]  }
   0x1   :  { %12 = vsyncpa [#allocation4], 0 }
   0x2   :  { %13 = vsyncpa [#allocation5], 0  ;;  %s19_s23 = sshll.u32 %s1658_s0, 4  ;;  %s27_s26 = sshll.u32 %s1659_s1, 4  ;;  %s20_s23 = int_to_ptr.vmem [resolvable:$true] %s19_s23  ;;  %s28_s26 = int_to_ptr.hbm [resolvable:$true] %s27_s26 }
   0x3   :  { %s1345_s27 = smov [#allocation3]   ;;  %s1346_s28 = smov [#allocation7]  }
   0x4   :  { %22 = dma.vmem_to_smem %s20_s23, 16, %s1345_s27, [#allocation6]  }
   0x5   :  { %s29_s29 = sshll.u32 %s1346_s28, 4  ;;  %s1347_s30 = smov 128   ;;  %s30_s29 = int_to_ptr.vmem [resolvable:$true] %s29_s29 }
   0x6   :  { %s1348_s7 = smov 8  }
   0x7   :  { %35 = dma.hbm_to_vmem [thread:$0]  %s28_s26, 2048, %s30_s29, [#allocation4], %s1347_s30, %s1347_s30, %s1348_s7  }
   0x8   :  { %1339 = dma.done.wait [#allocation6], 16  }
   0x9   :  { %1340 = vsyncadd [#allocation6], 4294967280 }
   0xa   :  { %1341 = dma.done.wait [#allocation4], 2048  }
   0xb   :  { %1342 = vsyncadd [#allocation4], 4294965248 }
   0xc   :  { %52 = sfence }
   0xd   :  { %v73_v0 = vld [vmem:[%s1661_s3 + $0x8] sm:$0xff]  ;;  %v72_v1 = vld [vmem:[%s1661_s3] sm:$0xff]  ;;  %vm74_vm0 = vcmask 130048   ;;  %v59_v3 = vld [vmem:[#allocation7 + $0x30] sm:$0xff]  ;;  %s1224_s15 = sld [smem:[#allocation3 + $0x1]]  ;;  %v524_v37 = vlaneseq  ;;  %vm625_vm4 = vcmask 179200  }
   0xe   :  { %153 = vmatpush.msra.mxu2 %v73_v0  ;;  %182 = vmatpush.msra.mxu3 %v73_v0  ;;  %v57_v2 = vld [vmem:[#allocation7 + $0x20] sm:$0xff]  ;;  %v55_v5 = vld [vmem:[#allocation7 + $0x10] sm:$0xff]  ;;  %v58_v6 = vld [vmem:[#allocation7 + $0x28] sm:$0xff]  ;;  %s1225_s16 = sld [smem:[#allocation3 + $0x2]]  ;;  %vm651_vm5 = vcmask 89088   ;;  %vm653_vm6 = vcmask 83968  }
   0xf   :  { %95 = vmatpush.msra.mxu0 %v73_v0  ;;  %124 = vmatpush.msra.mxu1 %v73_v0  ;;  %v53_v4 = vld [vmem:[#allocation7] sm:$0xff]  ;;  %v60_v7 = vld [vmem:[#allocation7 + $0x38] sm:$0xff]  ;;  %v54_v8 = vld [vmem:[#allocation7 + $0x8] sm:$0xff]  ;;  %v525_v38 = vshrl.u32 %v524_v37, 7  ;;  %v529_v39 = vand.u32 127, %v524_v37  ;;  %vm628_vm7 = vcmask 177152  }
  0x10   :  { %154 = vmatpush.msra.mxu2 %v72_v1  ;;  %183 = vmatpush.msra.mxu3 %v72_v1  ;;  %v56_v9 = vld [vmem:[#allocation7 + $0x18] sm:$0xff]  ;;  %v65_v10 = vld [vmem:[#allocation7 + $0x60] sm:$0xff]  ;;  %v67_v11 = vld [vmem:[#allocation7 + $0x70] sm:$0xff]  ;;  %vm704_vm8 = vcmask 1045504   ;;  %s1170_s29 = sshll.u32 %s1664_s6, 4  ;;  %s1171_s29 = int_to_ptr.hbm [resolvable:$true] %s1170_s29 }
  0x11   :  { %1188 = vmatmul.msk.f32.vlgmr.msra.gmra.mxu2 %vm74_vm0, %v57_v2  ;;  %1190 = vmatmul.msk.f32.vlgmr.msra.gmra.mxu3 %vm74_vm0, %v59_v3  ;;  %v61_v12 = vld [vmem:[#allocation7 + $0x40] sm:$0xff]  ;;  %v63_v13 = vld [vmem:[#allocation7 + $0x50] sm:$0xff]  ;;  %v66_v14 = vld [vmem:[#allocation7 + $0x68] sm:$0xff]  ;;  %v526_v40 = vadd.s32 8, %v525_v38  ;;  %vm533_vm1 = vcmp.lt.s32.totalorder %v529_v39, 11 }
  0x12   :  { %96 = vmatpush.msra.mxu0 %v72_v1  ;;  %125 = vmatpush.msra.mxu1 %v72_v1  ;;  %v68_v15 = vld [vmem:[#allocation7 + $0x78] sm:$0xff]  ;;  %v62_v16 = vld [vmem:[#allocation7 + $0x48] sm:$0xff]  ;;  %v69_v24 = vld [vmem:[%s1660_s2] sm:$0xff] }
  0x13   :  { %1184 = vmatmul.msk.f32.vlgmr.msra.gmra.mxu0 %vm74_vm0, %v53_v4  ;;  %1186 = vmatmul.msk.f32.vlgmr.msra.gmra.mxu1 %vm74_vm0, %v55_v5  ;;  %v64_v17 = vld [vmem:[#allocation7 + $0x58] sm:$0xff]  ;;  %v70_v29 = vld [vmem:[%s1660_s2 + $0x8] sm:$0xff]  ;;  %v71_v34 = vld [vmem:[%s1660_s2 + $0x10] sm:$0x3f]  ;;  %s534_s2 = sld [smem:[#allocation3]]  ;;  %v543_v43 = vstv %s1224_s15  ;;  %vm531_vm2 = vcmp.lt.s32.totalorder %v526_v40, 11 }
  0x14   :  { %269 = vmatpush.msrb.mxu2 %v73_v0  ;;  %298 = vmatpush.msrb.mxu3 %v73_v0  ;;  %v541_v42 = vstv %s1225_s16  ;;  %v1451_v45 = vsel %vm533_vm1, 0.0, %v543_v43  ;;  %vm538_vm3 = vmand %vm531_vm2, %vm533_vm1 }
  0x15   :  { %211 = vmatpush.msrb.mxu0 %v73_v0  ;;  %240 = vmatpush.msrb.mxu1 %v73_v0  ;;  %v1454_v46 = vsub.f32 0.0, %v1451_v45 }
  0x16   :  { %270 = vmatpush.msrb.mxu2 %v72_v1  ;;  %299 = vmatpush.msrb.mxu3 %v72_v1 }
  0x17   :  { %212 = vmatpush.msrb.mxu0 %v72_v1  ;;  %241 = vmatpush.msrb.mxu1 %v72_v1 }
  0x19   :  { %1189 = vmatmul.msk.f32.gmra.mxu2 %vm74_vm0, %v58_v6  ;;  %1191 = vmatmul.msk.f32.gmra.mxu3 %vm74_vm0, %v60_v7  ;;  %v540_v41 = vstv %s534_s2 }
  0x1a   :  { %v1449_v44 = vsel %vm533_vm1, %v540_v41, %v541_v42 }
  0x1b   :  { %1185 = vmatmul.msk.f32.gmra.mxu0 %vm74_vm0, %v54_v8  ;;  %1187 = vmatmul.msk.f32.gmra.mxu1 %vm74_vm0, %v56_v9  ;;  %v545_v47 = vsel %vm531_vm2, %v543_v43, %v1449_v44  ;;  %v1477_v4 = vsub.f32 0.0, %v1449_v44 }
  0x1c   :  { %v1459_v52 = vsel %vm538_vm3, 0.0, %v545_v47 }
  0x1d   :  { %v1464_v57 = vsub.f32 0.0, %v1459_v52 }
  0x21   :  { %1196 = vmatmul.msk.f32.vlgmr.msrb.gmra.mxu2 %vm74_vm0, %v65_v10  ;;  %1198 = vmatmul.msk.f32.vlgmr.msrb.gmra.mxu3 %vm74_vm0, %v67_v11 }
  0x23   :  { %1192 = vmatmul.msk.f32.vlgmr.msrb.gmra.mxu0 %vm74_vm0, %v61_v12  ;;  %1194 = vmatmul.msk.f32.vlgmr.msrb.gmra.mxu1 %vm74_vm0, %v63_v13 }
  0x29   :  { %1197 = vmatmul.msk.f32.gmra.mxu2 %vm74_vm0, %v66_v14  ;;  %1199 = vmatmul.msk.f32.gmra.mxu3 %vm74_vm0, %v68_v15 }
  0x2b   :  { %1193 = vmatmul.msk.f32.gmra.mxu0 %vm74_vm0, %v62_v16  ;;  %1195 = vmatmul.msk.f32.gmra.mxu1 %vm74_vm0, %v64_v17 }
  0x90   :  { %v98_v18 = vpop.f32.mrf.mxu0  ;;  %v127_v19 = vpop.f32.mrf.mxu1 }
  0x94   :  { %v156_v20 = vpop.f32.mrf.mxu2  ;;  %v185_v21 = vpop.f32.mrf.mxu3 }
  0x98   :  { %v101_v22 = vpop.f32.mrf.mxu0  ;;  %v130_v23 = vpop.f32.mrf.mxu1 }
  0x99   :  { %330 = vmatpush.msra.mxu0 %v101_v22  ;;  %356 = vmatpush.msra.mxu1 %v130_v23 }
  0x9b   :  { %331 = vmatpush.msra.mxu0 %v98_v18  ;;  %357 = vmatpush.msra.mxu1 %v127_v19 }
  0x9c   :  { %v159_v25 = vpop.f32.mrf.mxu2  ;;  %v188_v26 = vpop.f32.mrf.mxu3  ;;  %1200 = vmatmul.msk.f32.vlgmr.msra.gmra.mxu0 %vm74_vm0, %v69_v24  ;;  %1203 = vmatmul.msk.f32.vlgmr.msra.gmra.mxu1 %vm74_vm0, %v69_v24 }
  0x9d   :  { %382 = vmatpush.msra.mxu2 %v159_v25  ;;  %408 = vmatpush.msra.mxu3 %v188_v26 }
  0x9f   :  { %383 = vmatpush.msra.mxu2 %v156_v20  ;;  %409 = vmatpush.msra.mxu3 %v185_v21 }
  0xa0   :  { %1206 = vmatmul.msk.f32.vlgmr.msra.gmra.mxu2 %vm74_vm0, %v69_v24  ;;  %1209 = vmatmul.msk.f32.vlgmr.msra.gmra.mxu3 %vm74_vm0, %v69_v24  ;;  %v214_v27 = vpop.f32.mrf.mxu0  ;;  %v243_v28 = vpop.f32.mrf.mxu1 }
  0xa4   :  { %v272_v30 = vpop.f32.mrf.mxu2  ;;  %v301_v31 = vpop.f32.mrf.mxu3  ;;  %1201 = vmatmul.msk.f32.gmra.mxu0 %vm74_vm0, %v70_v29  ;;  %1204 = vmatmul.msk.f32.gmra.mxu1 %vm74_vm0, %v70_v29 }
  0xa8   :  { %1207 = vmatmul.msk.f32.gmra.mxu2 %vm74_vm0, %v70_v29  ;;  %1210 = vmatmul.msk.f32.gmra.mxu3 %vm74_vm0, %v70_v29  ;;  %v217_v32 = vpop.f32.mrf.mxu0  ;;  %v246_v33 = vpop.f32.mrf.mxu1 }
  0xa9   :  { %434 = vmatpush.msrb.mxu0 %v217_v32  ;;  %460 = vmatpush.msrb.mxu1 %v246_v33 }
  0xab   :  { %435 = vmatpush.msrb.mxu0 %v214_v27  ;;  %461 = vmatpush.msrb.mxu1 %v243_v28 }
  0xac   :  { %v275_v35 = vpop.f32.mrf.mxu2  ;;  %v304_v36 = vpop.f32.mrf.mxu3  ;;  %1202 = vmatmul.msk.f32.gmra.mxu0 %vm74_vm0, %v71_v34  ;;  %1205 = vmatmul.msk.f32.gmra.mxu1 %vm74_vm0, %v71_v34 }
  0xad   :  { %486 = vmatpush.msrb.mxu2 %v275_v35  ;;  %512 = vmatpush.msrb.mxu3 %v304_v36 }
  0xaf   :  { %487 = vmatpush.msrb.mxu2 %v272_v30  ;;  %513 = vmatpush.msrb.mxu3 %v301_v31 }
  0xb0   :  { %1208 = vmatmul.msk.f32.gmra.mxu2 %vm74_vm0, %v71_v34  ;;  %1211 = vmatmul.msk.f32.gmra.mxu3 %vm74_vm0, %v71_v34 }
  0xb4   :  { %1212 = vmatmul.msk.f32.vlgmr.msrb.gmra.mxu0 %vm74_vm0, %v69_v24  ;;  %1215 = vmatmul.msk.f32.vlgmr.msrb.gmra.mxu1 %vm74_vm0, %v69_v24 }
  0xb8   :  { %1218 = vmatmul.msk.f32.vlgmr.msrb.gmra.mxu2 %vm74_vm0, %v69_v24  ;;  %1221 = vmatmul.msk.f32.vlgmr.msrb.gmra.mxu3 %vm74_vm0, %v69_v24 }
  0xbc   :  { %1213 = vmatmul.msk.f32.gmra.mxu0 %vm74_vm0, %v70_v29  ;;  %1216 = vmatmul.msk.f32.gmra.mxu1 %vm74_vm0, %v70_v29 }
  0xc0   :  { %1219 = vmatmul.msk.f32.gmra.mxu2 %vm74_vm0, %v70_v29  ;;  %1222 = vmatmul.msk.f32.gmra.mxu3 %vm74_vm0, %v70_v29 }
  0xc4   :  { %1214 = vmatmul.msk.f32.gmra.mxu0 %vm74_vm0, %v71_v34  ;;  %1217 = vmatmul.msk.f32.gmra.mxu1 %vm74_vm0, %v71_v34 }
  0xc8   :  { %1220 = vmatmul.msk.f32.gmra.mxu2 %vm74_vm0, %v71_v34  ;;  %1223 = vmatmul.msk.f32.gmra.mxu3 %vm74_vm0, %v71_v34 }
 0x119   :  { %v333_v48 = vpop.f32.mrf.mxu0  ;;  %v359_v49 = vpop.f32.mrf.mxu1 }
 0x11a   :  { %v553_v50 = vmax.f32 %v1454_v46, %v333_v48  ;;  %v556_v51 = vmax.f32 %v1454_v46, %v359_v49 }
 0x11c   :  { %v577_v53 = vmin.f32 %v1451_v45, %v553_v50  ;;  %v580_v54 = vmin.f32 %v1451_v45, %v556_v51 }
 0x11e   :  { %v601_v55 = vsub.f32 %v333_v48, %v577_v53  ;;  %v604_v56 = vsub.f32 %v359_v49, %v580_v54 }
 0x120   :  { %626 = vst.msk [vmem:[#allocation2] sm:$0xff] %vm625_vm4, %v601_v55 }
 0x121   :  { %652 = vst.msk [vmem:[#allocation2] sm:$0xff] %vm651_vm5, %v601_v55  ;;  %v336_v58 = vpop.f32.mrf.mxu0  ;;  %v362_v59 = vpop.f32.mrf.mxu1 }
 0x122   :  { %630 = vst.msk [vmem:[#allocation2 + $0x18] sm:$0xff] %vm625_vm4, %v604_v56  ;;  %v554_v60 = vmax.f32 %v1464_v57, %v336_v58  ;;  %v557_v61 = vmax.f32 %v1464_v57, %v362_v59 }
 0x123   :  { %655 = vst.msk [vmem:[#allocation2 + $0x18] sm:$0xff] %vm651_vm5, %v604_v56  ;;  %v385_v62 = vpop.f32.mrf.mxu2  ;;  %v411_v63 = vpop.f32.mrf.mxu3 }
 0x124   :  { %v578_v0 = vmin.f32 %v1459_v52, %v554_v60  ;;  %v581_v1 = vmin.f32 %v1459_v52, %v557_v61  ;;  %v559_v2 = vmax.f32 %v1454_v46, %v385_v62  ;;  %v562_v3 = vmax.f32 %v1454_v46, %v411_v63 }
 0x126   :  { %v602_v5 = vsub.f32 %v336_v58, %v578_v0  ;;  %v605_v6 = vsub.f32 %v362_v59, %v581_v1  ;;  %v583_v7 = vmin.f32 %v1451_v45, %v559_v2  ;;  %v586_v8 = vmin.f32 %v1451_v45, %v562_v3  ;;  %v1528_v0 = vld [vmem:[%s1662_s4] sm:$0xff] }
 0x128   :  { %627 = vst.msk [vmem:[#allocation2 + $0x8] sm:$0xff] %vm625_vm4, %v602_v5  ;;  %v607_v9 = vsub.f32 %v385_v62, %v583_v7  ;;  %v610_v12 = vsub.f32 %v411_v63, %v586_v8  ;;  %v669_v55 = vld [vmem:[#allocation2] sm:$0xff] }
 0x129   :  { %654 = vst.msk [vmem:[#allocation2 + $0x8] sm:$0x7] %vm653_vm6, %v602_v5  ;;  %v339_v10 = vpop.f32.mrf.mxu0  ;;  %v365_v11 = vpop.f32.mrf.mxu1 }
 0x12a   :  { %631 = vst.msk [vmem:[#allocation2 + $0x20] sm:$0xff] %vm625_vm4, %v605_v6  ;;  %v555_v13 = vmax.f32 %v1477_v4, %v339_v10  ;;  %v558_v14 = vmax.f32 %v1477_v4, %v365_v11  ;;  %v672_v56 = vld [vmem:[#allocation2 + $0x18] sm:$0xff] }
 0x12b   :  { %656 = vst.msk [vmem:[#allocation2 + $0x20] sm:$0x7] %vm653_vm6, %v605_v6  ;;  %v388_v15 = vpop.f32.mrf.mxu2  ;;  %v414_v16 = vpop.f32.mrf.mxu3 }
 0x12c   :  { %633 = vst.msk [vmem:[#allocation2 + $0x30] sm:$0xff] %vm625_vm4, %v607_v9  ;;  %v579_v17 = vmin.f32 %v1449_v44, %v555_v13  ;;  %v582_v18 = vmin.f32 %v1449_v44, %v558_v14  ;;  %v560_v19 = vmax.f32 %v1464_v57, %v388_v15  ;;  %v563_v20 = vmax.f32 %v1464_v57, %v414_v16 }
 0x12d   :  { %657 = vst.msk [vmem:[#allocation2 + $0x30] sm:$0xff] %vm651_vm5, %v607_v9 }
 0x12e   :  { %636 = vst.msk [vmem:[#allocation2 + $0x48] sm:$0xff] %vm625_vm4, %v610_v12  ;;  %v603_v21 = vsub.f32 %v339_v10, %v579_v17  ;;  %v606_v22 = vsub.f32 %v365_v11, %v582_v18  ;;  %v584_v23 = vmin.f32 %v1459_v52, %v560_v19  ;;  %v587_v24 = vmin.f32 %v1459_v52, %v563_v20  ;;  %v1553_v19 = vld [vmem:[%s1662_s4 + $0x8] sm:$0xff] }
 0x12f   :  { %659 = vst.msk [vmem:[#allocation2 + $0x48] sm:$0xff] %vm651_vm5, %v610_v12 }
 0x130   :  { %629 = vst.msk [vmem:[#allocation2 + $0x10] sm:$0x3f] %vm628_vm7, %v603_v21  ;;  %v608_v25 = vsub.f32 %v388_v15, %v584_v23  ;;  %v611_v26 = vsub.f32 %v414_v16, %v587_v24  ;;  %v670_v42 = vld [vmem:[#allocation2 + $0x8] sm:$0xff] }
 0x131   :  { %632 = vst.msk [vmem:[#allocation2 + $0x28] sm:$0x3f] %vm628_vm7, %v606_v22  ;;  %v437_v27 = vpop.f32.mrf.mxu0  ;;  %v463_v28 = vpop.f32.mrf.mxu1 }
 0x132   :  { %634 = vst.msk [vmem:[#allocation2 + $0x38] sm:$0xff] %vm625_vm4, %v608_v25  ;;  %v565_v29 = vmax.f32 %v1454_v46, %v437_v27  ;;  %v568_v30 = vmax.f32 %v1454_v46, %v463_v28  ;;  %v673_v48 = vld [vmem:[#allocation2 + $0x20] sm:$0xff] }
 0x133   :  { %658 = vst.msk [vmem:[#allocation2 + $0x38] sm:$0x7] %vm653_vm6, %v608_v25  ;;  %v391_v31 = vpop.f32.mrf.mxu2  ;;  %v417_v32 = vpop.f32.mrf.mxu3 }
 0x134   :  { %637 = vst.msk [vmem:[#allocation2 + $0x50] sm:$0xff] %vm625_vm4, %v611_v26  ;;  %v589_v33 = vmin.f32 %v1451_v45, %v565_v29  ;;  %v592_v34 = vmin.f32 %v1451_v45, %v568_v30  ;;  %v561_v35 = vmax.f32 %v1477_v4, %v391_v31  ;;  %v564_v36 = vmax.f32 %v1477_v4, %v417_v32  ;;  %v675_v24 = vld [vmem:[#allocation2 + $0x30] sm:$0xff] }
 0x135   :  { %660 = vst.msk [vmem:[#allocation2 + $0x50] sm:$0x7] %vm653_vm6, %v611_v26 }
 0x136   :  { %v613_v37 = vsub.f32 %v437_v27, %v589_v33  ;;  %v616_v38 = vsub.f32 %v463_v28, %v592_v34  ;;  %v585_v39 = vmin.f32 %v1449_v44, %v561_v35  ;;  %v588_v40 = vmin.f32 %v1449_v44, %v564_v36  ;;  %v678_v26 = vld [vmem:[#allocation2 + $0x48] sm:$0xff] }
 0x137   :  { %v671_v41 = vld [vmem:[#allocation2 + $0x10] sm:$0x3f] }
 0x138   :  { %639 = vst.msk [vmem:[#allocation2 + $0x60] sm:$0xff] %vm625_vm4, %v613_v37  ;;  %v609_v43 = vsub.f32 %v391_v31, %v585_v39  ;;  %1226 = vmatpush.msk.msra.mxu0 %vm704_vm8, %v671_v41  ;;  %v674_v47 = vld [vmem:[#allocation2 + $0x28] sm:$0x3f]  ;;  %v612_v49 = vsub.f32 %v417_v32, %v588_v40 }
 0x139   :  { %661 = vst.msk [vmem:[#allocation2 + $0x60] sm:$0xff] %vm651_vm5, %v613_v37  ;;  %1229 = vmatpush.msk.msra.mxu1 %vm704_vm8, %v674_v47  ;;  %v440_v50 = vpop.f32.mrf.mxu0  ;;  %v466_v51 = vpop.f32.mrf.mxu1  ;;  %v696_v40 = vld [vmem:[%s1663_s5 + $0x8] sm:$0xff] }
 0x13a   :  { %642 = vst.msk [vmem:[#allocation2 + $0x78] sm:$0xff] %vm625_vm4, %v616_v38  ;;  %v566_v53 = vmax.f32 %v1464_v57, %v440_v50  ;;  %v569_v54 = vmax.f32 %v1464_v57, %v466_v51  ;;  %722 = vmatpush.msra.mxu0 %v670_v42  ;;  %v676_v18 = vld [vmem:[#allocation2 + $0x38] sm:$0xff]  ;;  %v695_v42 = vld [vmem:[%s1663_s5] sm:$0xff] }
 0x13b   :  { %663 = vst.msk [vmem:[#allocation2 + $0x78] sm:$0xff] %vm651_vm5, %v616_v38  ;;  %748 = vmatpush.msra.mxu1 %v673_v48  ;;  %v489_v58 = vpop.f32.mrf.mxu2  ;;  %v515_v59 = vpop.f32.mrf.mxu3 }
 0x13c   :  { %635 = vst.msk [vmem:[#allocation2 + $0x40] sm:$0x3f] %vm628_vm7, %v609_v43  ;;  %v590_v60 = vmin.f32 %v1459_v52, %v566_v53  ;;  %v593_v61 = vmin.f32 %v1459_v52, %v569_v54  ;;  %v571_v62 = vmax.f32 %v1454_v46, %v489_v58  ;;  %v574_v63 = vmax.f32 %v1454_v46, %v515_v59  ;;  %v679_v23 = vld [vmem:[#allocation2 + $0x50] sm:$0xff] }
 0x13d   :  { %638 = vst.msk [vmem:[#allocation2 + $0x58] sm:$0x3f] %vm628_vm7, %v612_v49  ;;  %723 = vmatpush.msra.mxu0 %v669_v55  ;;  %749 = vmatpush.msra.mxu1 %v672_v56 }
 0x13e   :  { %v614_v1 = vsub.f32 %v440_v50, %v590_v60  ;;  %v617_v2 = vsub.f32 %v466_v51, %v593_v61  ;;  %v595_v3 = vmin.f32 %v1451_v45, %v571_v62  ;;  %v598_v5 = vmin.f32 %v1451_v45, %v574_v63  ;;  %1227 = vmatmul.msk.f32.vlgmr.msra.gmra.mxu0 %vm625_vm4, %v1528_v0 }
 0x13f   :  { %1230 = vmatmul.msk.f32.vlgmr.msra.gmra.mxu1 %vm625_vm4, %v1528_v0 }
 0x140   :  { %640 = vst.msk [vmem:[#allocation2 + $0x68] sm:$0xff] %vm625_vm4, %v614_v1  ;;  %v619_v46 = vsub.f32 %v489_v58, %v595_v3  ;;  %v622_v8 = vsub.f32 %v515_v59, %v598_v5  ;;  %v681_v39 = vld [vmem:[#allocation2 + $0x60] sm:$0xff] }
 0x141   :  { %662 = vst.msk [vmem:[#allocation2 + $0x68] sm:$0x7] %vm653_vm6, %v614_v1  ;;  %v443_v6 = vpop.f32.mrf.mxu0  ;;  %v469_v7 = vpop.f32.mrf.mxu1 }
 0x142   :  { %643 = vst.msk [vmem:[#allocation2 + $0x80] sm:$0xff] %vm625_vm4, %v617_v2  ;;  %v567_v9 = vmax.f32 %v1477_v4, %v443_v6  ;;  %v570_v45 = vmax.f32 %v1477_v4, %v469_v7 }
 0x143   :  { %664 = vst.msk [vmem:[#allocation2 + $0x80] sm:$0x7] %vm653_vm6, %v617_v2  ;;  %v677_v10 = vld [vmem:[#allocation2 + $0x40] sm:$0x3f]  ;;  %v492_v11 = vpop.f32.mrf.mxu2  ;;  %v518_v12 = vpop.f32.mrf.mxu3 }
 0x144   :  { %645 = vst.msk [vmem:[#allocation2 + $0x90] sm:$0xff] %vm625_vm4, %v619_v46  ;;  %v591_v13 = vmin.f32 %v1449_v44, %v567_v9  ;;  %v594_v14 = vmin.f32 %v1449_v44, %v570_v45  ;;  %1232 = vmatpush.msk.msra.mxu2 %vm704_vm8, %v677_v10  ;;  %v680_v15 = vld [vmem:[#allocation2 + $0x58] sm:$0x3f]  ;;  %v572_v16 = vmax.f32 %v1464_v57, %v492_v11 }
 0x145   :  { %665 = vst.msk [vmem:[#allocation2 + $0x90] sm:$0xff] %vm651_vm5, %v619_v46  ;;  %1235 = vmatpush.msk.msra.mxu3 %vm704_vm8, %v680_v15  ;;  %v575_v17 = vmax.f32 %v1464_v57, %v518_v12 }
 0x146   :  { %648 = vst.msk [vmem:[#allocation2 + $0xa8] sm:$0xff] %vm625_vm4, %v622_v8  ;;  %v615_v20 = vsub.f32 %v443_v6, %v591_v13  ;;  %v618_v21 = vsub.f32 %v469_v7, %v594_v14  ;;  %v596_v22 = vmin.f32 %v1459_v52, %v572_v16  ;;  %774 = vmatpush.msra.mxu2 %v676_v18 }
 0x147   :  { %1228 = vmatmul.msk.f32.gmra.mxu0 %vm625_vm4, %v1553_v19  ;;  %667 = vst.msk [vmem:[#allocation2 + $0xa8] sm:$0xff] %vm651_vm5, %v622_v8  ;;  %v599_v57 = vmin.f32 %v1459_v52, %v575_v17  ;;  %800 = vmatpush.msra.mxu3 %v679_v23 }
 0x148   :  { %1231 = vmatmul.msk.f32.gmra.mxu1 %vm625_vm4, %v1553_v19  ;;  %641 = vst.msk [vmem:[#allocation2 + $0x70] sm:$0x3f] %vm628_vm7, %v615_v20  ;;  %v620_v25 = vsub.f32 %v492_v11, %v596_v22  ;;  %775 = vmatpush.msra.mxu2 %v675_v24  ;;  %v682_v34 = vld [vmem:[#allocation2 + $0x68] sm:$0xff] }
 0x149   :  { %644 = vst.msk [vmem:[#allocation2 + $0x88] sm:$0x3f] %vm628_vm7, %v618_v21  ;;  %v623_v27 = vsub.f32 %v518_v12, %v599_v57  ;;  %801 = vmatpush.msra.mxu3 %v678_v26  ;;  %1233 = vmatmul.msk.f32.vlgmr.msra.gmra.mxu2 %vm625_vm4, %v1528_v0 }
 0x14a   :  { %646 = vst.msk [vmem:[#allocation2 + $0x98] sm:$0xff] %vm625_vm4, %v620_v25  ;;  %1236 = vmatmul.msk.f32.vlgmr.msra.gmra.mxu3 %vm625_vm4, %v1528_v0  ;;  %v685_v38 = vld [vmem:[#allocation2 + $0x80] sm:$0xff] }
 0x14b   :  { %666 = vst.msk [vmem:[#allocation2 + $0x98] sm:$0x7] %vm653_vm6, %v620_v25  ;;  %v495_v52 = vpop.f32.mrf.mxu2  ;;  %v521_v28 = vpop.f32.mrf.mxu3 }
 0x14c   :  { %649 = vst.msk [vmem:[#allocation2 + $0xb0] sm:$0xff] %vm625_vm4, %v623_v27  ;;  %v573_v29 = vmax.f32 %v1477_v4, %v495_v52  ;;  %v576_v30 = vmax.f32 %v1477_v4, %v521_v28  ;;  %v684_v4 = vld [vmem:[#allocation2 + $0x78] sm:$0xff]  ;;  %v687_v49 = vld [vmem:[#allocation2 + $0x90] sm:$0xff] }
 0x14d   :  { %668 = vst.msk [vmem:[#allocation2 + $0xb0] sm:$0x7] %vm653_vm6, %v623_v27 }
 0x14e   :  { %v597_v31 = vmin.f32 %v1449_v44, %v573_v29  ;;  %v600_v32 = vmin.f32 %v1449_v44, %v576_v30  ;;  %v697_v44 = vld [vmem:[%s1663_s5 + $0x10] sm:$0x3f]  ;;  %v690_v50 = vld [vmem:[#allocation2 + $0xa8] sm:$0xff]  ;;  %s1349_s5 = smov [#allocation8]  }
 0x14f   :  { %v683_v33 = vld [vmem:[#allocation2 + $0x70] sm:$0x3f]  ;;  %s1168_s26 = sshll.u32 %s1349_s5, 4  ;;  %s1169_s26 = int_to_ptr.vmem [resolvable:$true] %s1168_s26 }
 0x150   :  { %v621_v35 = vsub.f32 %v495_v52, %v597_v31  ;;  %v624_v36 = vsub.f32 %v521_v28, %v600_v32  ;;  %1238 = vmatpush.msk.msrb.mxu0 %vm704_vm8, %v683_v33  ;;  %v686_v37 = vld [vmem:[#allocation2 + $0x88] sm:$0x3f] }
 0x151   :  { %1241 = vmatpush.msk.msrb.mxu1 %vm704_vm8, %v686_v37  ;;  %1234 = vmatmul.msk.f32.gmra.mxu2 %vm625_vm4, %v1553_v19 }
 0x152   :  { %647 = vst.msk [vmem:[#allocation2 + $0xa0] sm:$0x3f] %vm628_vm7, %v621_v35  ;;  %826 = vmatpush.msrb.mxu0 %v682_v34  ;;  %1237 = vmatmul.msk.f32.gmra.mxu3 %vm625_vm4, %v1553_v19  ;;  %v688_v47 = vld [vmem:[#allocation2 + $0x98] sm:$0xff] }
 0x153   :  { %650 = vst.msk [vmem:[#allocation2 + $0xb8] sm:$0x3f] %vm628_vm7, %v624_v36  ;;  %852 = vmatpush.msrb.mxu1 %v685_v38 }
 0x154   :  { %827 = vmatpush.msrb.mxu0 %v681_v39  ;;  %v691_v48 = vld [vmem:[#allocation2 + $0xb0] sm:$0xff] }
 0x155   :  { %853 = vmatpush.msrb.mxu1 %v684_v4  ;;  %1239 = vmatmul.msk.f32.vlgmr.msrb.gmra.mxu0 %vm625_vm4, %v1528_v0 }
 0x156   :  { %1242 = vmatmul.msk.f32.vlgmr.msrb.gmra.mxu1 %vm625_vm4, %v1528_v0  ;;  %1250 = vmatpush.msk.msra.mxu0 %vm704_vm8, %v697_v44 }
 0x157   :  { %1253 = vmatpush.msk.msra.mxu1 %vm704_vm8, %v697_v44 }
 0x158   :  { %936 = vmatpush.msra.mxu0 %v696_v40 }
 0x159   :  { %v689_v41 = vld [vmem:[#allocation2 + $0xa0] sm:$0x3f]  ;;  %965 = vmatpush.msra.mxu1 %v696_v40 }
 0x15a   :  { %1244 = vmatpush.msk.msrb.mxu2 %vm704_vm8, %v689_v41  ;;  %v692_v43 = vld [vmem:[#allocation2 + $0xb8] sm:$0x3f]  ;;  %937 = vmatpush.msra.mxu0 %v695_v42 }
 0x15b   :  { %1247 = vmatpush.msk.msrb.mxu3 %vm704_vm8, %v692_v43  ;;  %966 = vmatpush.msra.mxu1 %v695_v42 }
 0x15c   :  { %878 = vmatpush.msrb.mxu2 %v688_v47  ;;  %1262 = vmatpush.msk.msrb.mxu0 %vm704_vm8, %v697_v44 }
 0x15d   :  { %904 = vmatpush.msrb.mxu3 %v691_v48  ;;  %1240 = vmatmul.msk.f32.gmra.mxu0 %vm625_vm4, %v1553_v19 }
 0x15e   :  { %879 = vmatpush.msrb.mxu2 %v687_v49  ;;  %1243 = vmatmul.msk.f32.gmra.mxu1 %vm625_vm4, %v1553_v19 }
 0x15f   :  { %905 = vmatpush.msrb.mxu3 %v690_v50  ;;  %1245 = vmatmul.msk.f32.vlgmr.msrb.gmra.mxu2 %vm625_vm4, %v1528_v0 }
 0x160   :  { %1248 = vmatmul.msk.f32.vlgmr.msrb.gmra.mxu3 %vm625_vm4, %v1528_v0  ;;  %1256 = vmatpush.msk.msra.mxu2 %vm704_vm8, %v697_v44 }
 0x161   :  { %1259 = vmatpush.msk.msra.mxu3 %vm704_vm8, %v697_v44  ;;  %1265 = vmatpush.msk.msrb.mxu1 %vm704_vm8, %v697_v44 }
 0x162   :  { %994 = vmatpush.msra.mxu2 %v696_v40  ;;  %1052 = vmatpush.msrb.mxu0 %v696_v40 }
 0x163   :  { %1023 = vmatpush.msra.mxu3 %v696_v40  ;;  %1081 = vmatpush.msrb.mxu1 %v696_v40 }
 0x164   :  { %995 = vmatpush.msra.mxu2 %v695_v42  ;;  %1053 = vmatpush.msrb.mxu0 %v695_v42 }
 0x165   :  { %1024 = vmatpush.msra.mxu3 %v695_v42  ;;  %1082 = vmatpush.msrb.mxu1 %v695_v42 }
 0x166   :  { %1268 = vmatpush.msk.msrb.mxu2 %vm704_vm8, %v697_v44 }
 0x167   :  { %1271 = vmatpush.msk.msrb.mxu3 %vm704_vm8, %v697_v44  ;;  %1246 = vmatmul.msk.f32.gmra.mxu2 %vm625_vm4, %v1553_v19 }
 0x168   :  { %1249 = vmatmul.msk.f32.gmra.mxu3 %vm625_vm4, %v1553_v19  ;;  %1110 = vmatpush.msrb.mxu2 %v696_v40 }
 0x169   :  { %1139 = vmatpush.msrb.mxu3 %v696_v40 }
 0x16a   :  { %1111 = vmatpush.msrb.mxu2 %v695_v42 }
 0x16b   :  { %1140 = vmatpush.msrb.mxu3 %v695_v42 }
 0x1bb   :  { %v725_v51 = vpop.f32.mrf.mxu0 }
 0x1bc   :  { %v751_v53 = vpop.f32.mrf.mxu1  ;;  %1251 = vmatmul.msk.f32.vlgmr.msra.gmra.mxu0 %vm625_vm4, %v725_v51 }
 0x1bd   :  { %1254 = vmatmul.msk.f32.vlgmr.msra.gmra.mxu1 %vm625_vm4, %v751_v53 }
 0x1c4   :  { %v728_v54 = vpop.f32.mrf.mxu0 }
 0x1c5   :  { %v754_v55 = vpop.f32.mrf.mxu1  ;;  %1252 = vmatmul.msk.f32.gmra.mxu0 %vm625_vm4, %v728_v54 }
 0x1c6   :  { %1255 = vmatmul.msk.f32.gmra.mxu1 %vm625_vm4, %v754_v55 }
 0x1cc   :  { %v777_v56 = vpop.f32.mrf.mxu2 }
 0x1cd   :  { %v803_v58 = vpop.f32.mrf.mxu3  ;;  %1257 = vmatmul.msk.f32.vlgmr.msra.gmra.mxu2 %vm625_vm4, %v777_v56 }
 0x1ce   :  { %1260 = vmatmul.msk.f32.vlgmr.msra.gmra.mxu3 %vm625_vm4, %v803_v58 }
 0x1d2   :  { %v829_v59 = vpop.f32.mrf.mxu0 }
 0x1d3   :  { %v855_v60 = vpop.f32.mrf.mxu1  ;;  %1263 = vmatmul.msk.f32.vlgmr.msrb.gmra.mxu0 %vm625_vm4, %v829_v59 }
 0x1d4   :  { %v780_v61 = vpop.f32.mrf.mxu2  ;;  %1266 = vmatmul.msk.f32.vlgmr.msrb.gmra.mxu1 %vm625_vm4, %v855_v60 }
 0x1d5   :  { %v806_v62 = vpop.f32.mrf.mxu3  ;;  %1258 = vmatmul.msk.f32.gmra.mxu2 %vm625_vm4, %v780_v61 }
 0x1d6   :  { %1261 = vmatmul.msk.f32.gmra.mxu3 %vm625_vm4, %v806_v62 }
 0x1da   :  { %v832_v63 = vpop.f32.mrf.mxu0 }
 0x1db   :  { %v858_v0 = vpop.f32.mrf.mxu1  ;;  %1264 = vmatmul.msk.f32.gmra.mxu0 %vm625_vm4, %v832_v63 }
 0x1dc   :  { %1267 = vmatmul.msk.f32.gmra.mxu1 %vm625_vm4, %v858_v0 }
 0x1e2   :  { %v881_v1 = vpop.f32.mrf.mxu2 }
 0x1e3   :  { %v907_v2 = vpop.f32.mrf.mxu3  ;;  %1269 = vmatmul.msk.f32.vlgmr.msrb.gmra.mxu2 %vm625_vm4, %v881_v1 }
 0x1e4   :  { %1272 = vmatmul.msk.f32.vlgmr.msrb.gmra.mxu3 %vm625_vm4, %v907_v2 }
 0x1ea   :  { %v884_v3 = vpop.f32.mrf.mxu2 }
 0x1eb   :  { %v910_v5 = vpop.f32.mrf.mxu3  ;;  %1270 = vmatmul.msk.f32.gmra.mxu2 %vm625_vm4, %v884_v3 }
 0x1ec   :  { %1273 = vmatmul.msk.f32.gmra.mxu3 %vm625_vm4, %v910_v5 }
 0x239   :  { %v939_v46 = vpop.f32.mrf.mxu0 }
 0x23a   :  { %1148 = vst.msk [vmem:[#allocation8] sm:$0xff] %vm74_vm0, %v939_v46  ;;  %v968_v6 = vpop.f32.mrf.mxu1 }
 0x23b   :  { %1150 = vst.msk [vmem:[#allocation8 + $0x10] sm:$0xff] %vm74_vm0, %v968_v6 }
 0x242   :  { %v942_v7 = vpop.f32.mrf.mxu0 }
 0x243   :  { %1149 = vst.msk [vmem:[#allocation8 + $0x8] sm:$0xff] %vm74_vm0, %v942_v7  ;;  %v971_v8 = vpop.f32.mrf.mxu1 }
 0x244   :  { %1151 = vst.msk [vmem:[#allocation8 + $0x18] sm:$0xff] %vm74_vm0, %v971_v8 }
 0x250   :  { %v997_v9 = vpop.f32.mrf.mxu2  ;;  %v1055_v45 = vpop.f32.mrf.mxu0 }
 0x251   :  { %1152 = vst.msk [vmem:[#allocation8 + $0x20] sm:$0xff] %vm74_vm0, %v997_v9  ;;  %v1026_v10 = vpop.f32.mrf.mxu3  ;;  %v1084_v11 = vpop.f32.mrf.mxu1 }
 0x252   :  { %1154 = vst.msk [vmem:[#allocation8 + $0x30] sm:$0xff] %vm74_vm0, %v1026_v10 }
 0x253   :  { %1156 = vst.msk [vmem:[#allocation8 + $0x40] sm:$0xff] %vm74_vm0, %v1055_v45 }
 0x254   :  { %1158 = vst.msk [vmem:[#allocation8 + $0x50] sm:$0xff] %vm74_vm0, %v1084_v11 }
 0x258   :  { %v1000_v12 = vpop.f32.mrf.mxu2  ;;  %v1058_v13 = vpop.f32.mrf.mxu0 }
 0x259   :  { %1153 = vst.msk [vmem:[#allocation8 + $0x28] sm:$0xff] %vm74_vm0, %v1000_v12  ;;  %v1029_v14 = vpop.f32.mrf.mxu3  ;;  %v1087_v15 = vpop.f32.mrf.mxu1 }
 0x25a   :  { %1155 = vst.msk [vmem:[#allocation8 + $0x38] sm:$0xff] %vm74_vm0, %v1029_v14 }
 0x25b   :  { %1157 = vst.msk [vmem:[#allocation8 + $0x48] sm:$0xff] %vm74_vm0, %v1058_v13 }
 0x25c   :  { %1159 = vst.msk [vmem:[#allocation8 + $0x58] sm:$0xff] %vm74_vm0, %v1087_v15 }
 0x266   :  { %v1113_v16 = vpop.f32.mrf.mxu2 }
 0x267   :  { %1160 = vst.msk [vmem:[#allocation8 + $0x60] sm:$0xff] %vm74_vm0, %v1113_v16  ;;  %v1142_v17 = vpop.f32.mrf.mxu3 }
 0x268   :  { %1162 = vst.msk [vmem:[#allocation8 + $0x70] sm:$0xff] %vm74_vm0, %v1142_v17 }
 0x26e   :  { %v1116_v18 = vpop.f32.mrf.mxu2 }
 0x26f   :  { %1161 = vst.msk [vmem:[#allocation8 + $0x68] sm:$0xff] %vm74_vm0, %v1116_v18  ;;  %v1145_v19 = vpop.f32.mrf.mxu3 }
 0x270   :  { %1163 = vst.msk [vmem:[#allocation8 + $0x78] sm:$0xff] %vm74_vm0, %v1145_v19 }
 0x271   :  { %1176 = dma.vmem_to_hbm [thread:$0]  %s1169_s26, 2048, %s1171_s29, [#allocation5], %s1347_s30, %s1347_s30, %s1348_s7  }
 0x272   :  { %1343 = dma.done.wait [#allocation5], 2048  }
 0x273   :  { %1344 = vsyncadd [#allocation5], 4294965248 }
 0x274   :  { %1181 = vsyncpa [#allocation4], 1 }
 0x275   :  { %1182 = vsyncpa [#allocation5], 1 }
 0x276   :  { %1183 = vsyncpa [#allocation6], 1 }

</bundles_post_ra>
